<compile_context>
chip_gen: v5e
topology: v5e:2x2
jax: 0.10.0
libtpu: 0.0.40
codegen_flags: <defaults>
</compile_context>

<pallas_src>
import functools

import jax
import jax.numpy as jnp
from jax.experimental import pallas as pl
from jax.experimental.pallas import tpu as pltpu


def _round_up(x, m):
    return (x + m - 1) // m * m


def _gelu_tanh(x):
    # GELU with approximate='tanh' (matches torch.nn.GELU(approximate='tanh')), f32.
    c0 = jnp.float32(0.7978845608028654)  # sqrt(2/pi)
    return 0.5 * x * (1.0 + jnp.tanh(c0 * (x + 0.044715 * x * x * x)))


def resnet_block_kernel(x_ref,
                        w1a_ref, b1a_ref, w1b_ref, b1b_ref,
                        w2a_ref, b2a_ref, w2b_ref, b2b_ref,
                        o_ref, *, c_real, eps):
    x = x_ref[...].astype(jnp.float32)

    # Lanes >= c_real are zero padding; they must not contribute to LN stats.
    lane = jax.lax.broadcasted_iota(jnp.int32, x.shape, dimension=1)
    mask = lane < c_real
    inv_c = jnp.float32(1.0 / c_real)
    eps_f = jnp.float32(eps)

    def layernorm(v):
        # `v` has zeros in the padded lanes on entry.
        mean = jnp.sum(v, axis=-1, keepdims=True) * inv_c
        cen = jnp.where(mask, v - mean, 0.0)
        var = jnp.sum(cen * cen, axis=-1, keepdims=True) * inv_c
        return cen * jax.lax.rsqrt(var + eps_f)          # padded lanes stay 0

    def mlp(v, wa_ref, ba_ref, wb_ref, bb_ref):
        # bf16 operands on the MXU, f32 accumulation; GELU in f32.
        h = jnp.dot(v.astype(jnp.bfloat16), wa_ref[...],
                    preferred_element_type=jnp.float32) + ba_ref[...]
        h = _gelu_tanh(h)
        return jnp.dot(h.astype(jnp.bfloat16), wb_ref[...],
                       preferred_element_type=jnp.float32) + bb_ref[...]

    h = layernorm(x)                                     # x = norm1(x)
    h = h + mlp(h, w1a_ref, b1a_ref, w1b_ref, b1b_ref)   # x = x + mlp1(x)
    h = layernorm(h)                                     # x = norm2(x)
    h = h + mlp(h, w2a_ref, b2a_ref, w2b_ref, b2b_ref)   # x = x + mlp2(x)
    o_ref[...] = h.astype(o_ref.dtype)


def resnet_block(x, params, *, eps=1e-6, tm_max=256):
    """x: (B, N, C) float32. params: dict of f32 MLP weights/biases."""
    B, N, C = x.shape
    H = params["w1a"].shape[1]
    rows = B * N

    # Row tile: large (up to 256) but never forced back by divisibility.
    tm = min(tm_max, _round_up(rows, 8))
    rows_p = _round_up(rows, tm)
    Cp = _round_up(C, 128)          # lane-dense channel dim
    Hp = _round_up(H, 128)          # lane-dense MLP hidden dim

    x2d = x.reshape(rows, C)
    if (rows_p, Cp) != (rows, C):
        x2d = jnp.pad(x2d, ((0, rows_p - rows), (0, Cp - C)))

    def pad2(a, r, c):
        return jnp.pad(a, ((0, r - a.shape[0]), (0, c - a.shape[1])))

    bf16 = jnp.bfloat16
    w1a = pad2(params["w1a"].astype(bf16), Cp, Hp)
    w1b = pad2(params["w1b"].astype(bf16), Hp, Cp)
    w2a = pad2(params["w2a"].astype(bf16), Cp, Hp)
    w2b = pad2(params["w2b"].astype(bf16), Hp, Cp)
    b1a = pad2(params["b1a"].astype(jnp.float32), 1, Hp)
    b1b = pad2(params["b1b"].astype(jnp.float32), 1, Cp)
    b2a = pad2(params["b2a"].astype(jnp.float32), 1, Hp)
    b2b = pad2(params["b2b"].astype(jnp.float32), 1, Cp)

    grid = (rows_p // tm,)
    row_spec = pl.BlockSpec((tm, Cp), lambda i: (i, 0))

    def vmem_full():
        # Whole array resident in VMEM for the full grid: single-buffered,
        # no per-step re-DMA of the (constant-index) weights.
        return pl.BlockSpec(memory_space=pltpu.MemorySpace.VMEM)

    # Explicit VMEM budget: resident bf16 weights + f32 biases, double-buffered
    # f32 row tiles (in + out), in-kernel f32 intermediates, plus headroom.
    bytes_w = 4 * Cp * Hp * 2 + 2 * (Hp + Cp) * 4
    bytes_io = 2 * 2 * tm * Cp * 4
    bytes_tmp = 8 * tm * max(Cp, Hp) * 4
    vmem_limit = int(1.25 * (bytes_w + bytes_io + bytes_tmp)) + (2 << 20)
    vmem_limit = max(8 << 20, min(vmem_limit, 64 << 20))

    cost = pl.CostEstimate(
        flops=8 * rows_p * Cp * Hp,            # 4 matmuls x 2 flops/MAC
        transcendentals=2 * rows_p * Hp,       # tanh per GELU element
        bytes_accessed=2 * rows_p * Cp * 4 + bytes_w,
    )

    kernel = functools.partial(resnet_block_kernel, c_real=C, eps=eps)

    out2d = pl.pallas_call(
        kernel,
        out_shape=jax.ShapeDtypeStruct((rows_p, Cp), x.dtype),
        grid_spec=pltpu.PrefetchScalarGridSpec(
            num_scalar_prefetch=0,
            grid=grid,
            in_specs=[
                row_spec,                    # x row tile
                vmem_full(), vmem_full(),    # mlp1.fc1 W, b
                vmem_full(), vmem_full(),    # mlp1.fc2 W, b
                vmem_full(), vmem_full(),    # mlp2.fc1 W, b
                vmem_full(), vmem_full(),    # mlp2.fc2 W, b
            ],
            out_specs=row_spec,
        ),
        compiler_params=pltpu.CompilerParams(
            dimension_semantics=("parallel",),
            vmem_limit_bytes=vmem_limit,
        ),
        cost_estimate=cost,
    )(x2d, w1a, b1a, w1b, b1b, w2a, b2a, w2b, b2b)

    return out2d[:rows, :C].reshape(B, N, C)


# ---------------------------------------------------------------------------
# Parameter init (Xavier-uniform weights, zero biases == initialize_weights())
# ---------------------------------------------------------------------------
def xavier_uniform(key, fan_in, fan_out, dtype=jnp.float32):
    bound = (6.0 / (fan_in + fan_out)) ** 0.5
    return jax.random.uniform(key, (fan_in, fan_out), dtype,
                              minval=-bound, maxval=bound)


def init_params(key, hidden_size, mlp_ratio=4.0):
    C = hidden_size
    H = int(hidden_size * mlp_ratio)
    k1, k2, k3, k4 = jax.random.split(key, 4)
    return {
        "w1a": xavier_uniform(k1, C, H), "b1a": jnp.zeros((1, H), jnp.float32),
        "w1b": xavier_uniform(k2, H, C), "b1b": jnp.zeros((1, C), jnp.float32),
        "w2a": xavier_uniform(k3, C, H), "b2a": jnp.zeros((1, H), jnp.float32),
        "w2b": xavier_uniform(k4, H, C), "b2b": jnp.zeros((1, C), jnp.float32),
    }


# ---------------------------------------------------------------------------
# Pure-JAX references
# ---------------------------------------------------------------------------
def _reference(x, p, eps=1e-6, matmul_dtype=jnp.float32):
    """matmul_dtype=bfloat16 mirrors the kernel's MXU math (f32 accumulation)."""
    def ln(v):
        mu = jnp.mean(v, axis=-1, keepdims=True)
        var = jnp.mean((v - mu) ** 2, axis=-1, keepdims=True)
        return (v - mu) * jax.lax.rsqrt(var + jnp.float32(eps))

    def mlp(v, wa, ba, wb, bb):
        h = jnp.dot(v.astype(matmul_dtype), wa.astype(matmul_dtype),
                    preferred_element_type=jnp.float32) + ba[0]
        h = _gelu_tanh(h)
        return jnp.dot(h.astype(matmul_dtype), wb.astype(matmul_dtype),
                       preferred_element_type=jnp.float32) + bb[0]

    h = ln(x.astype(jnp.float32))
    h = h + mlp(h, p["w1a"], p["b1a"], p["w1b"], p["b1b"])
    h = ln(h)
    h = h + mlp(h, p["w2a"], p["b2a"], p["w2b"], p["b2b"])
    return h


if __name__ == "__main__":
    key = jax.random.PRNGKey(0)
    kx, kp = jax.random.split(key)

    B, N, C = 2, 8, 32          # batch, sequence, hidden_size
    x = jax.random.normal(kx, (B, N, C), jnp.float32)
    params = init_params(kp, hidden_size=C, mlp_ratio=4.0)

    out = jax.block_until_ready(resnet_block(x, params))
    assert out.shape == (B, N, C)
    assert not bool(jnp.any(jnp.isnan(out)))

    # Tight check vs. a reference that mirrors the kernel's mixed-precision math.
    ref_bf16 = _reference(x, params, matmul_dtype=jnp.bfloat16)
    assert jnp.allclose(out, ref_bf16, atol=5e-3, rtol=5e-3), \
        float(jnp.max(jnp.abs(out - ref_bf16)))

    # Looser check vs. the exact fp32 module semantics (bf16 operand rounding).
    ref_f32 = _reference(x, params, matmul_dtype=jnp.float32)
    assert jnp.allclose(out, ref_f32, atol=6e-2, rtol=6e-2), \
        float(jnp.max(jnp.abs(out - ref_f32)))

    print("KERNEL_OK")
</pallas_src>

<mosaic_0001>
module attributes {stable_mosaic.version = 11 : i64} {
  func.func @resnet_block_kernel(%arg0: i32, %arg1: memref<16x128xf32, #tpu.memory_space<vmem>>, %arg2: memref<128x128xbf16, #tpu.memory_space<vmem>>, %arg3: memref<1x128xf32, #tpu.memory_space<vmem>>, %arg4: memref<128x128xbf16, #tpu.memory_space<vmem>>, %arg5: memref<1x128xf32, #tpu.memory_space<vmem>>, %arg6: memref<128x128xbf16, #tpu.memory_space<vmem>>, %arg7: memref<1x128xf32, #tpu.memory_space<vmem>>, %arg8: memref<128x128xbf16, #tpu.memory_space<vmem>>, %arg9: memref<1x128xf32, #tpu.memory_space<vmem>>, %arg10: memref<16x128xf32, #tpu.memory_space<vmem>>) attributes {dimension_semantics = [#tpu.dimension_semantics<parallel>], iteration_bounds = array<i64: 1>, scalar_prefetch = 0 : i64, scratch_operands = 0 : i64, tpu.core_type = #tpu.core_type<tc>, window_params = [{transform_indices = @transform_0, window_bounds = array<i64: 16, 128>}, {pipeline_mode = #tpu.pipeline_mode<synchronous>, transform_indices = @transform_1, window_bounds = array<i64: 128, 128>}, {pipeline_mode = #tpu.pipeline_mode<synchronous>, transform_indices = @transform_2, window_bounds = array<i64: 1, 128>}, {pipeline_mode = #tpu.pipeline_mode<synchronous>, transform_indices = @transform_3, window_bounds = array<i64: 128, 128>}, {pipeline_mode = #tpu.pipeline_mode<synchronous>, transform_indices = @transform_4, window_bounds = array<i64: 1, 128>}, {pipeline_mode = #tpu.pipeline_mode<synchronous>, transform_indices = @transform_5, window_bounds = array<i64: 128, 128>}, {pipeline_mode = #tpu.pipeline_mode<synchronous>, transform_indices = @transform_6, window_bounds = array<i64: 1, 128>}, {pipeline_mode = #tpu.pipeline_mode<synchronous>, transform_indices = @transform_7, window_bounds = array<i64: 128, 128>}, {pipeline_mode = #tpu.pipeline_mode<synchronous>, transform_indices = @transform_8, window_bounds = array<i64: 1, 128>}, {transform_indices = @transform_9, window_bounds = array<i64: 16, 128>}]} {
    %c0 = arith.constant 0 : index
    %c0_0 = arith.constant 0 : index
    %0 = vector.load %arg1[%c0, %c0_0] : memref<16x128xf32, #tpu.memory_space<vmem>>, vector<16x128xf32>
    %1 = tpu.iota {dimensions = array<i32: 1>} : vector<16x128xi32>
    %c32_i32 = arith.constant 32 : i32
    %2 = vector.broadcast %c32_i32 : i32 to vector<16x128xi32>
    %3 = arith.cmpi slt, %1, %2 : vector<16x128xi32>
    %cst = arith.constant dense<0.000000e+00> : vector<16xf32>
    %4 = vector.multi_reduction <add>, %0, %cst [1] : vector<16x128xf32> to vector<16xf32>
    %5 = vector.shape_cast %4 : vector<16xf32> to vector<16x1xf32>
    %cst_1 = arith.constant 3.125000e-02 : f32
    %6 = vector.broadcast %cst_1 : f32 to vector<16x1xf32>
    %7 = arith.mulf %5, %6 : vector<16x1xf32>
    %8 = vector.broadcast %7 : vector<16x1xf32> to vector<16x128xf32>
    %9 = arith.subf %0, %8 : vector<16x128xf32>
    %cst_2 = arith.constant 0.000000e+00 : f32
    %10 = vector.broadcast %cst_2 : f32 to vector<16x128xf32>
    %11 = arith.select %3, %9, %10 : vector<16x128xi1>, vector<16x128xf32>
    %12 = arith.mulf %11, %11 : vector<16x128xf32>
    %cst_3 = arith.constant dense<0.000000e+00> : vector<16xf32>
    %13 = vector.multi_reduction <add>, %12, %cst_3 [1] : vector<16x128xf32> to vector<16xf32>
    %14 = vector.shape_cast %13 : vector<16xf32> to vector<16x1xf32>
    %cst_4 = arith.constant 3.125000e-02 : f32
    %15 = vector.broadcast %cst_4 : f32 to vector<16x1xf32>
    %16 = arith.mulf %14, %15 : vector<16x1xf32>
    %cst_5 = arith.constant 9.99999997E-7 : f32
    %17 = vector.broadcast %cst_5 : f32 to vector<16x1xf32>
    %18 = arith.addf %16, %17 : vector<16x1xf32>
    %19 = math.rsqrt %18 : vector<16x1xf32>
    %20 = vector.broadcast %19 : vector<16x1xf32> to vector<16x128xf32>
    %21 = arith.mulf %11, %20 : vector<16x128xf32>
    %22 = arith.truncf %21 : vector<16x128xf32> to vector<16x128xbf16>
    %c0_6 = arith.constant 0 : index
    %c0_7 = arith.constant 0 : index
    %23 = vector.load %arg2[%c0_6, %c0_7] : memref<128x128xbf16, #tpu.memory_space<vmem>>, vector<128x128xbf16>
    %cst_8 = arith.constant dense<0.000000e+00> : vector<16x128xf32>
    %24 = tpu.matmul %22, %23, %cst_8 {dimension_numbers = #tpu.dot_dimension_numbers<[1], [0], [0], [1], [0, 0, 1, 1], [], []>} : vector<16x128xbf16>, vector<128x128xbf16>, vector<16x128xf32> -> vector<16x128xf32>
    %c0_9 = arith.constant 0 : index
    %c0_10 = arith.constant 0 : index
    %25 = vector.load %arg3[%c0_9, %c0_10] : memref<1x128xf32, #tpu.memory_space<vmem>>, vector<1x128xf32>
    %26 = vector.broadcast %25 : vector<1x128xf32> to vector<16x128xf32>
    %27 = arith.addf %24, %26 : vector<16x128xf32>
    %cst_11 = arith.constant 5.000000e-01 : f32
    %28 = vector.broadcast %cst_11 : f32 to vector<16x128xf32>
    %29 = arith.mulf %28, %27 : vector<16x128xf32>
    %cst_12 = arith.constant 4.471500e-02 : f32
    %30 = vector.broadcast %cst_12 : f32 to vector<16x128xf32>
    %31 = arith.mulf %30, %27 : vector<16x128xf32>
    %32 = arith.mulf %31, %27 : vector<16x128xf32>
    %33 = arith.mulf %32, %27 : vector<16x128xf32>
    %34 = arith.addf %27, %33 : vector<16x128xf32>
    %cst_13 = arith.constant 0.797884583 : f32
    %35 = vector.broadcast %cst_13 : f32 to vector<16x128xf32>
    %36 = arith.mulf %35, %34 : vector<16x128xf32>
    %37 = math.tanh %36 : vector<16x128xf32>
    %cst_14 = arith.constant 1.000000e+00 : f32
    %38 = vector.broadcast %cst_14 : f32 to vector<16x128xf32>
    %39 = arith.addf %38, %37 : vector<16x128xf32>
    %40 = arith.mulf %29, %39 : vector<16x128xf32>
    %41 = arith.truncf %40 : vector<16x128xf32> to vector<16x128xbf16>
    %c0_15 = arith.constant 0 : index
    %c0_16 = arith.constant 0 : index
    %42 = vector.load %arg4[%c0_15, %c0_16] : memref<128x128xbf16, #tpu.memory_space<vmem>>, vector<128x128xbf16>
    %cst_17 = arith.constant dense<0.000000e+00> : vector<16x128xf32>
    %43 = tpu.matmul %41, %42, %cst_17 {dimension_numbers = #tpu.dot_dimension_numbers<[1], [0], [0], [1], [0, 0, 1, 1], [], []>} : vector<16x128xbf16>, vector<128x128xbf16>, vector<16x128xf32> -> vector<16x128xf32>
    %c0_18 = arith.constant 0 : index
    %c0_19 = arith.constant 0 : index
    %44 = vector.load %arg5[%c0_18, %c0_19] : memref<1x128xf32, #tpu.memory_space<vmem>>, vector<1x128xf32>
    %45 = vector.broadcast %44 : vector<1x128xf32> to vector<16x128xf32>
    %46 = arith.addf %43, %45 : vector<16x128xf32>
    %47 = arith.addf %21, %46 : vector<16x128xf32>
    %cst_20 = arith.constant dense<0.000000e+00> : vector<16xf32>
    %48 = vector.multi_reduction <add>, %47, %cst_20 [1] : vector<16x128xf32> to vector<16xf32>
    %49 = vector.shape_cast %48 : vector<16xf32> to vector<16x1xf32>
    %cst_21 = arith.constant 3.125000e-02 : f32
    %50 = vector.broadcast %cst_21 : f32 to vector<16x1xf32>
    %51 = arith.mulf %49, %50 : vector<16x1xf32>
    %52 = vector.broadcast %51 : vector<16x1xf32> to vector<16x128xf32>
    %53 = arith.subf %47, %52 : vector<16x128xf32>
    %cst_22 = arith.constant 0.000000e+00 : f32
    %54 = vector.broadcast %cst_22 : f32 to vector<16x128xf32>
    %55 = arith.select %3, %53, %54 : vector<16x128xi1>, vector<16x128xf32>
    %56 = arith.mulf %55, %55 : vector<16x128xf32>
    %cst_23 = arith.constant dense<0.000000e+00> : vector<16xf32>
    %57 = vector.multi_reduction <add>, %56, %cst_23 [1] : vector<16x128xf32> to vector<16xf32>
    %58 = vector.shape_cast %57 : vector<16xf32> to vector<16x1xf32>
    %cst_24 = arith.constant 3.125000e-02 : f32
    %59 = vector.broadcast %cst_24 : f32 to vector<16x1xf32>
    %60 = arith.mulf %58, %59 : vector<16x1xf32>
    %cst_25 = arith.constant 9.99999997E-7 : f32
    %61 = vector.broadcast %cst_25 : f32 to vector<16x1xf32>
    %62 = arith.addf %60, %61 : vector<16x1xf32>
    %63 = math.rsqrt %62 : vector<16x1xf32>
    %64 = vector.broadcast %63 : vector<16x1xf32> to vector<16x128xf32>
    %65 = arith.mulf %55, %64 : vector<16x128xf32>
    %66 = arith.truncf %65 : vector<16x128xf32> to vector<16x128xbf16>
    %c0_26 = arith.constant 0 : index
    %c0_27 = arith.constant 0 : index
    %67 = vector.load %arg6[%c0_26, %c0_27] : memref<128x128xbf16, #tpu.memory_space<vmem>>, vector<128x128xbf16>
    %cst_28 = arith.constant dense<0.000000e+00> : vector<16x128xf32>
    %68 = tpu.matmul %66, %67, %cst_28 {dimension_numbers = #tpu.dot_dimension_numbers<[1], [0], [0], [1], [0, 0, 1, 1], [], []>} : vector<16x128xbf16>, vector<128x128xbf16>, vector<16x128xf32> -> vector<16x128xf32>
    %c0_29 = arith.constant 0 : index
    %c0_30 = arith.constant 0 : index
    %69 = vector.load %arg7[%c0_29, %c0_30] : memref<1x128xf32, #tpu.memory_space<vmem>>, vector<1x128xf32>
    %70 = vector.broadcast %69 : vector<1x128xf32> to vector<16x128xf32>
    %71 = arith.addf %68, %70 : vector<16x128xf32>
    %cst_31 = arith.constant 5.000000e-01 : f32
    %72 = vector.broadcast %cst_31 : f32 to vector<16x128xf32>
    %73 = arith.mulf %72, %71 : vector<16x128xf32>
    %cst_32 = arith.constant 4.471500e-02 : f32
    %74 = vector.broadcast %cst_32 : f32 to vector<16x128xf32>
    %75 = arith.mulf %74, %71 : vector<16x128xf32>
    %76 = arith.mulf %75, %71 : vector<16x128xf32>
    %77 = arith.mulf %76, %71 : vector<16x128xf32>
    %78 = arith.addf %71, %77 : vector<16x128xf32>
    %cst_33 = arith.constant 0.797884583 : f32
    %79 = vector.broadcast %cst_33 : f32 to vector<16x128xf32>
    %80 = arith.mulf %79, %78 : vector<16x128xf32>
    %81 = math.tanh %80 : vector<16x128xf32>
    %cst_34 = arith.constant 1.000000e+00 : f32
    %82 = vector.broadcast %cst_34 : f32 to vector<16x128xf32>
    %83 = arith.addf %82, %81 : vector<16x128xf32>
    %84 = arith.mulf %73, %83 : vector<16x128xf32>
    %85 = arith.truncf %84 : vector<16x128xf32> to vector<16x128xbf16>
    %c0_35 = arith.constant 0 : index
    %c0_36 = arith.constant 0 : index
    %86 = vector.load %arg8[%c0_35, %c0_36] : memref<128x128xbf16, #tpu.memory_space<vmem>>, vector<128x128xbf16>
    %cst_37 = arith.constant dense<0.000000e+00> : vector<16x128xf32>
    %87 = tpu.matmul %85, %86, %cst_37 {dimension_numbers = #tpu.dot_dimension_numbers<[1], [0], [0], [1], [0, 0, 1, 1], [], []>} : vector<16x128xbf16>, vector<128x128xbf16>, vector<16x128xf32> -> vector<16x128xf32>
    %c0_38 = arith.constant 0 : index
    %c0_39 = arith.constant 0 : index
    %88 = vector.load %arg9[%c0_38, %c0_39] : memref<1x128xf32, #tpu.memory_space<vmem>>, vector<1x128xf32>
    %89 = vector.broadcast %88 : vector<1x128xf32> to vector<16x128xf32>
    %90 = arith.addf %87, %89 : vector<16x128xf32>
    %91 = arith.addf %65, %90 : vector<16x128xf32>
    %c0_40 = arith.constant 0 : index
    %c0_41 = arith.constant 0 : index
    %92 = vector.load %arg10[%c0_40, %c0_41] : memref<16x128xf32, #tpu.memory_space<vmem>>, vector<16x128xf32>
    tpu.vector_store %arg10[%c0_40, %c0_41], %91 {strides = array<i32>} : memref<16x128xf32, #tpu.memory_space<vmem>>, vector<16x128xf32>,
    return
  }
  func.func @transform_0(%arg0: i32) -> (i32, i32) {
    %c0_i32 = arith.constant 0 : i32
    %c0_i32_0 = arith.constant 0 : i32
    return %arg0, %c0_i32 : i32, i32
  }
  func.func @transform_1(%arg0: i32) -> (i32, i32) {
    %c0_i32 = arith.constant 0 : i32
    %c0_i32_0 = arith.constant 0 : i32
    %c0_i32_1 = arith.constant 0 : i32
    return %c0_i32, %c0_i32_0 : i32, i32
  }
  func.func @transform_2(%arg0: i32) -> (i32, i32) {
    %c0_i32 = arith.constant 0 : i32
    %c0_i32_0 = arith.constant 0 : i32
    %c0_i32_1 = arith.constant 0 : i32
    return %c0_i32, %c0_i32_0 : i32, i32
  }
  func.func @transform_3(%arg0: i32) -> (i32, i32) {
    %c0_i32 = arith.constant 0 : i32
    %c0_i32_0 = arith.constant 0 : i32
    %c0_i32_1 = arith.constant 0 : i32
    return %c0_i32, %c0_i32_0 : i32, i32
  }
  func.func @transform_4(%arg0: i32) -> (i32, i32) {
    %c0_i32 = arith.constant 0 : i32
    %c0_i32_0 = arith.constant 0 : i32
    %c0_i32_1 = arith.constant 0 : i32
    return %c0_i32, %c0_i32_0 : i32, i32
  }
  func.func @transform_5(%arg0: i32) -> (i32, i32) {
    %c0_i32 = arith.constant 0 : i32
    %c0_i32_0 = arith.constant 0 : i32
    %c0_i32_1 = arith.constant 0 : i32
    return %c0_i32, %c0_i32_0 : i32, i32
  }
  func.func @transform_6(%arg0: i32) -> (i32, i32) {
    %c0_i32 = arith.constant 0 : i32
    %c0_i32_0 = arith.constant 0 : i32
    %c0_i32_1 = arith.constant 0 : i32
    return %c0_i32, %c0_i32_0 : i32, i32
  }
  func.func @transform_7(%arg0: i32) -> (i32, i32) {
    %c0_i32 = arith.constant 0 : i32
    %c0_i32_0 = arith.constant 0 : i32
    %c0_i32_1 = arith.constant 0 : i32
    return %c0_i32, %c0_i32_0 : i32, i32
  }
  func.func @transform_8(%arg0: i32) -> (i32, i32) {
    %c0_i32 = arith.constant 0 : i32
    %c0_i32_0 = arith.constant 0 : i32
    %c0_i32_1 = arith.constant 0 : i32
    return %c0_i32, %c0_i32_0 : i32, i32
  }
  func.func @transform_9(%arg0: i32) -> (i32, i32) {
    %c0_i32 = arith.constant 0 : i32
    %c0_i32_0 = arith.constant 0 : i32
    return %arg0, %c0_i32 : i32, i32
  }
}

</mosaic_0001>

<bundles_post_ra>
// kernel: tpu_custom_call.1
= control target key start
LH: loop header
LB: loop body
LE: loop exit
PB: predicated region body
PF: predicated region fallthrough
CT: control target
= control target key end

     0   :  { %14 = vsyncpa [#allocation3], 0  ;;  %s1056_s0 = inlined_call_operand.hbm [shape: f32[16,128], index: 0, kind: input, shape index: {}]   ;;  %s1057_s1 = inlined_call_operand.hbm [shape: bf16[128,128], index: 1, kind: input, shape index: {}]   ;;  %s1058_s2 = inlined_call_operand.vmem [shape: f32[1,128], index: 2, kind: input, shape index: {}]   ;;  %s1059_s3 = inlined_call_operand.hbm [shape: bf16[128,128], index: 3, kind: input, shape index: {}]   ;;  %s1060_s4 = inlined_call_operand.vmem [shape: f32[1,128], index: 4, kind: input, shape index: {}]   ;;  %s1061_s5 = inlined_call_operand.hbm [shape: bf16[128,128], index: 5, kind: input, shape index: {}]   ;;  %s1062_s6 = inlined_call_operand.vmem [shape: f32[1,128], index: 6, kind: input, shape index: {}]   ;;  %s1063_s7 = inlined_call_operand.hbm [shape: bf16[128,128], index: 7, kind: input, shape index: {}]   ;;  %s1064_s8 = inlined_call_operand.vmem [shape: f32[1,128], index: 8, kind: input, shape index: {}]   ;;  %s1065_s9 = inlined_call_operand.hbm [shape: f32[16,128], index: 9, kind: output, shape index: {}]  }
   0x1   :  { %15 = vsyncpa [#allocation6], 0 }
   0x2   :  { %16 = vsyncpa [#allocation9], 0  ;;  %s35_s11 = sshll.u32 %s1057_s1, 4  ;;  %s36_s11 = int_to_ptr.hbm [resolvable:$true] %s35_s11 }
   0x3   :  { %17 = vsyncpa [#allocation4], 0  ;;  %s937_s12 = smov [#allocation5]   ;;  %s65_s16 = sshll.u32 %s1061_s5, 4  ;;  %s66_s16 = int_to_ptr.hbm [resolvable:$true] %s65_s16 }
   0x4   :  { %s37_s13 = sshll.u32 %s937_s12, 4  ;;  %s938_s17 = smov 64   ;;  %s38_s13 = int_to_ptr.vmem [resolvable:$true] %s37_s13 }
   0x5   :  { %s939_s18 = smov 4   ;;  %s940_s19 = smov [#allocation8]  }
   0x6   :  { %43 = dma.hbm_to_vmem [thread:$0]  %s36_s11, 1024, %s38_s13, [#allocation6], %s938_s17, %s938_s17, %s939_s18  }
   0x7   :  { %s67_s20 = sshll.u32 %s940_s19, 4  ;;  %s22_s22 = sshll.u32 %s1056_s0, 4  ;;  %s68_s20 = int_to_ptr.vmem [resolvable:$true] %s67_s20  ;;  %s23_s22 = int_to_ptr.hbm [resolvable:$true] %s22_s22 }
   0x8   :  { %73 = dma.hbm_to_vmem [thread:$0]  %s66_s16, 1024, %s68_s20, [#allocation9], %s938_s17, %s938_s17, %s939_s18  }
   0x9   :  { %s941_s5 = smov [#allocation2]   ;;  %s50_s26 = sshll.u32 %s1059_s3, 4  ;;  %s51_s26 = int_to_ptr.hbm [resolvable:$true] %s50_s26 }
   0xa   :  { %s24_s23 = sshll.u32 %s941_s5, 4  ;;  %s942_s27 = smov 128   ;;  %s25_s23 = int_to_ptr.vmem [resolvable:$true] %s24_s23 }
   0xb   :  { %s943_s28 = smov 8   ;;  %s944_s0 = smov [#allocation7]  }
   0xc   :  { %30 = dma.hbm_to_vmem [thread:$0]  %s23_s22, 256, %s25_s23, [#allocation3], %s942_s27, %s942_s27, %s943_s28  }
   0xd   :  { %s52_s29 = sshll.u32 %s944_s0, 4  ;;  %s80_s11 = sshll.u32 %s1063_s7, 4  ;;  %s53_s29 = int_to_ptr.vmem [resolvable:$true] %s52_s29  ;;  %s81_s11 = int_to_ptr.hbm [resolvable:$true] %s80_s11 }
   0xe   :  { %58 = dma.hbm_to_vmem [thread:$0]  %s51_s26, 1024, %s53_s29, [#allocation6], %s938_s17, %s938_s17, %s939_s18  }
   0xf   :  { %s945_s3 = smov [#allocation10]  }
  0x10   :  { %s82_s12 = sshll.u32 %s945_s3, 4  ;;  %s83_s12 = int_to_ptr.vmem [resolvable:$true] %s82_s12 }
  0x11   :  { %88 = dma.hbm_to_vmem [thread:$0]  %s81_s11, 1024, %s83_s12, [#allocation9], %s938_s17, %s938_s17, %s939_s18  }
  0x12   :  { %929 = dma.done.wait [#allocation3], 256  }
  0x13   :  { %930 = vsyncadd [#allocation3], 4294967040 }
  0x14   :  { %931 = dma.done.wait [#allocation6], 2048  }
  0x15   :  { %932 = vsyncadd [#allocation6], 4294965248 }
  0x16   :  { %933 = dma.done.wait [#allocation9], 2048  }
  0x17   :  { %934 = vsyncadd [#allocation9], 4294965248  ;;  %v111_v0 = vld [vmem:[#allocation2] sm:$0xff]  ;;  %v112_v1 = vld [vmem:[#allocation2 + $0x8] sm:$0xff]  ;;  %v113_v2 = vlaneseq  ;;  %s946_s17 = smov [#allocation11]   ;;  %s580_s21 = sshll.u32 %s1065_s9, 4  ;;  %s581_s21 = int_to_ptr.hbm [resolvable:$true] %s580_s21 }
  0x18   :  { %116 = vadd.xlane.f32.xlu0 %v111_v0  ;;  %v730_v14 = vld [vmem:[#allocation5 + $0x38] sm:$0xff]  ;;  %v729_v15 = vld [vmem:[#allocation5 + $0x30] sm:$0xff]  ;;  %v728_v16 = vld [vmem:[#allocation5 + $0x28] sm:$0xff]  ;;  %s578_s18 = sshll.u32 %s946_s17, 4  ;;  %s579_s18 = int_to_ptr.vmem [resolvable:$true] %s578_s18 }
  0x19   :  { %v1027_v3 = vand.u32 127, %v113_v2  ;;  %227 = vmatpush.bf16.msra.mxu0 %v730_v14  ;;  %v727_v17 = vld [vmem:[#allocation5 + $0x20] sm:$0xff]  ;;  %v726_v18 = vld [vmem:[#allocation5 + $0x18] sm:$0xff]  ;;  %v725_v19 = vld [vmem:[#allocation5 + $0x10] sm:$0xff] }
  0x1a   :  { %v724_v20 = vld [vmem:[#allocation5 + $0x8] sm:$0xff]  ;;  %v723_v21 = vld [vmem:[#allocation5] sm:$0xff]  ;;  %v738_v45 = vld [vmem:[#allocation7 + $0x38] sm:$0xff] }
  0x1b   :  { %vm115_vm0 = vcmp.lt.s32.totalorder %v1027_v3, 32  ;;  %328 = vmatpush.bf16.msra.mxu1 %v738_v45  ;;  %v737_v46 = vld [vmem:[#allocation7 + $0x30] sm:$0xff]  ;;  %v736_v47 = vld [vmem:[#allocation7 + $0x28] sm:$0xff]  ;;  %v735_v48 = vld [vmem:[#allocation7 + $0x20] sm:$0xff] }
  0x1c   :  { %v734_v49 = vld [vmem:[#allocation7 + $0x18] sm:$0xff]  ;;  %v733_v50 = vld [vmem:[#allocation7 + $0x10] sm:$0xff]  ;;  %v732_v51 = vld [vmem:[#allocation7 + $0x8] sm:$0xff] }
  0x1d   :  { %228 = vmatpush.bf16.msra.mxu0 %v729_v15  ;;  %v731_v52 = vld [vmem:[#allocation7] sm:$0xff]  ;;  %v765_v53 = vld [vmem:[%s1058_s2] ss:$0 sm:$0xff] }
  0x1e   :  { %v766_v14 = vld [vmem:[%s1060_s4] ss:$0 sm:$0xff] }
  0x1f   :  { %329 = vmatpush.bf16.msra.mxu1 %v737_v46 }
  0x20   :  { %118 = vadd.xlane.f32.xlu0 %v112_v1 }
  0x21   :  { %229 = vmatpush.bf16.msra.mxu0 %v728_v16 }
  0x23   :  { %330 = vmatpush.bf16.msra.mxu1 %v736_v47 }
  0x25   :  { %230 = vmatpush.bf16.msra.mxu0 %v727_v17 }
  0x27   :  { %331 = vmatpush.bf16.msra.mxu1 %v735_v48 }
  0x29   :  { %231 = vmatpush.bf16.msra.mxu0 %v726_v18 }
  0x2b   :  { %332 = vmatpush.bf16.msra.mxu1 %v734_v49 }
  0x2d   :  { %232 = vmatpush.bf16.msra.mxu0 %v725_v19 }
  0x2f   :  { %333 = vmatpush.bf16.msra.mxu1 %v733_v50 }
  0x31   :  { %233 = vmatpush.bf16.msra.mxu0 %v724_v20 }
  0x33   :  { %334 = vmatpush.bf16.msra.mxu1 %v732_v51 }
  0x35   :  { %234 = vmatpush.bf16.msra.mxu0 %v723_v21 }
  0x37   :  { %335 = vmatpush.bf16.msra.mxu1 %v731_v52 }
  0x8b   :  { %v117_v4 = vpop.xlane.xlu0 %116 }
  0x8c   :  { %v120_v5 = vmul.f32 0.03125, %v117_v4 }
  0x8e   :  { %v122_v6 = vsub.f32 %v111_v0, %v120_v5 }
  0x90   :  { %v124_v7 = vsel %vm115_vm0, %v122_v6, 0.0 }
  0x91   :  { %v126_v8 = vmul.f32 %v124_v7, %v124_v7 }
  0x93   :  { %128 = vadd.xlane.f32.xlu1 %v126_v8  ;;  %v119_v9 = vpop.xlane.xlu0 %118 }
  0x94   :  { %v121_v10 = vmul.f32 0.03125, %v119_v9 }
  0x96   :  { %v123_v11 = vsub.f32 %v112_v1, %v121_v10 }
  0x98   :  { %v125_v12 = vsel %vm115_vm0, %v123_v11, 0.0 }
  0x99   :  { %v127_v13 = vmul.f32 %v125_v12, %v125_v12 }
  0x9b   :  { %130 = vadd.xlane.f32.xlu1 %v127_v13 }
 0x106   :  { %v129_v22 = vpop.xlane.xlu1 %128 }
 0x107   :  { %v132_v23 = vmul.f32 0.03125, %v129_v22 }
 0x109   :  { %v134_v24 = vadd.f32 1e-06, %v132_v23 }
 0x10b   :  { %769 = vrsqrt.f32 %v134_v24  ;;  %vm142_vm2 = vweird.f32 %v134_v24 }
 0x10e   :  { %v131_v25 = vpop.xlane.xlu1 %130 }
 0x10f   :  { %v133_v26 = vmul.f32 0.03125, %v131_v25 }
 0x111   :  { %v770_v27 = vpop.eup %769  ;;  %v135_v28 = vadd.f32 1e-06, %v133_v26 }
 0x112   :  { %v137_v29 = vmul.f32 %v770_v27, %v134_v24  ;;  %vm143_vm1 = vweird.f32 %v770_v27 }
 0x113   :  { %771 = vrsqrt.f32 %v135_v28  ;;  %vm144_vm4 = vmor %vm142_vm2, %vm143_vm1  ;;  %vm152_vm5 = vweird.f32 %v135_v28 }
 0x114   :  { %v138_v30 = vmul.f32 %v770_v27, %v137_v29 }
 0x116   :  { %v139_v31 = vmul.f32 0.5, %v138_v30 }
 0x118   :  { %v140_v33 = vsub.f32 1.5, %v139_v31  ;;  %v746_v31 = vld [vmem:[#allocation8 + $0x38] sm:$0xff] }
 0x119   :  { %v772_v32 = vpop.eup %771  ;;  %455 = vmatpush.bf16.msra.mxu2 %v746_v31 }
 0x11a   :  { %v147_v34 = vmul.f32 %v772_v32, %v135_v28  ;;  %v141_v37 = vmul.f32 %v770_v27, %v140_v33  ;;  %vm153_vm3 = vweird.f32 %v772_v32  ;;  %v744_v33 = vld [vmem:[#allocation8 + $0x28] sm:$0xff] }
 0x11b   :  { %vm154_vm6 = vmor %vm152_vm5, %vm153_vm3 }
 0x11c   :  { %v148_v35 = vmul.f32 %v772_v32, %v147_v34  ;;  %v145_v39 = vsel %vm144_vm4, %v770_v27, %v141_v37  ;;  %v743_v34 = vld [vmem:[#allocation8 + $0x20] sm:$0xff]  ;;  %v740_v37 = vld [vmem:[#allocation8 + $0x8] sm:$0xff] }
 0x11d   :  { %v156_v42 = vmul.f32 %v145_v39, %v124_v7 }
 0x11e   :  { %v149_v36 = vmul.f32 0.5, %v148_v35  ;;  %v742_v35 = vld [vmem:[#allocation8 + $0x18] sm:$0xff] }
 0x120   :  { %v150_v38 = vsub.f32 1.5, %v149_v36  ;;  %v741_v36 = vld [vmem:[#allocation8 + $0x10] sm:$0xff] }
 0x122   :  { %v151_v40 = vmul.f32 %v772_v32, %v150_v38  ;;  %v739_v38 = vld [vmem:[#allocation8] sm:$0xff] }
 0x124   :  { %v155_v41 = vsel %vm154_vm6, %v772_v32, %v151_v40  ;;  %v745_v32 = vld [vmem:[#allocation8 + $0x30] sm:$0xff] }
 0x125   :  { %v157_v43 = vmul.f32 %v155_v41, %v125_v12  ;;  %456 = vmatpush.bf16.msra.mxu2 %v745_v32 }
 0x127   :  { %v158_v44 = vpack.c.bf16 %v157_v43, %v156_v42 }
 0x129   :  { %235 = vmatmul.bf16.vlgmr.msra.gmra.mxu0 %v158_v44  ;;  %457 = vmatpush.bf16.msra.mxu2 %v744_v33 }
 0x12d   :  { %458 = vmatpush.bf16.msra.mxu2 %v743_v34 }
 0x131   :  { %459 = vmatpush.bf16.msra.mxu2 %v742_v35 }
 0x135   :  { %460 = vmatpush.bf16.msra.mxu2 %v741_v36 }
 0x139   :  { %461 = vmatpush.bf16.msra.mxu2 %v740_v37 }
 0x13d   :  { %462 = vmatpush.bf16.msra.mxu2 %v739_v38 }
 0x1a6   :  { %v236_v54 = vpop.f32.mrf.mxu0 }
 0x1a7   :  { %v237_v55 = vadd.f32 %v765_v53, %v236_v54 }
 0x1a9   :  { %v243_v56 = vmul.f32 0.044715, %v237_v55  ;;  %v241_v8 = vmul.f32 0.5, %v237_v55 }
 0x1ab   :  { %v245_v57 = vmul.f32 %v243_v56, %v237_v55 }
 0x1ad   :  { %v247_v58 = vmul.f32 %v245_v57, %v237_v55 }
 0x1ae   :  { %v238_v59 = vpop.f32.mrf.mxu0 }
 0x1af   :  { %v239_v60 = vadd.f32 %v765_v53, %v238_v59  ;;  %v249_v61 = vadd.f32 %v247_v58, %v237_v55 }
 0x1b1   :  { %v244_v62 = vmul.f32 0.044715, %v239_v60  ;;  %v251_v0 = vmul.f32 0.7978846, %v249_v61  ;;  %v242_v9 = vmul.f32 0.5, %v239_v60  ;;  %v754_v61 = vld [vmem:[#allocation10 + $0x38] sm:$0xff] }
 0x1b2   :  { %556 = vmatpush.bf16.msra.mxu3 %v754_v61 }
 0x1b3   :  { %v246_v63 = vmul.f32 %v244_v62, %v239_v60  ;;  %773 = vtanh.f32 %v251_v0  ;;  %v753_v62 = vld [vmem:[#allocation10 + $0x30] sm:$0xff]  ;;  %v751_v0 = vld [vmem:[#allocation10 + $0x20] sm:$0xff] }
 0x1b5   :  { %v248_v1 = vmul.f32 %v246_v63, %v239_v60  ;;  %v752_v63 = vld [vmem:[#allocation10 + $0x28] sm:$0xff] }
 0x1b6   :  { %557 = vmatpush.bf16.msra.mxu3 %v753_v62 }
 0x1b7   :  { %v250_v2 = vadd.f32 %v248_v1, %v239_v60  ;;  %v750_v1 = vld [vmem:[#allocation10 + $0x18] sm:$0xff] }
 0x1b9   :  { %v252_v4 = vmul.f32 0.7978846, %v250_v2  ;;  %v774_v5 = vpop.eup %773  ;;  %v749_v2 = vld [vmem:[#allocation10 + $0x10] sm:$0xff] }
 0x1ba   :  { %v255_v6 = vadd.f32 1.0, %v774_v5  ;;  %558 = vmatpush.bf16.msra.mxu3 %v752_v63  ;;  %v747_v5 = vld [vmem:[#allocation10] sm:$0xff] }
 0x1bb   :  { %775 = vtanh.f32 %v252_v4  ;;  %v748_v4 = vld [vmem:[#allocation10 + $0x8] sm:$0xff] }
 0x1bc   :  { %v257_v11 = vmul.f32 %v255_v6, %v241_v8  ;;  %v767_v6 = vld [vmem:[%s1062_s6] ss:$0 sm:$0xff] }
 0x1be   :  { %559 = vmatpush.bf16.msra.mxu3 %v751_v0 }
 0x1c1   :  { %v776_v7 = vpop.eup %775 }
 0x1c2   :  { %v256_v10 = vadd.f32 1.0, %v776_v7  ;;  %560 = vmatpush.bf16.msra.mxu3 %v750_v1 }
 0x1c4   :  { %v258_v12 = vmul.f32 %v256_v10, %v242_v9 }
 0x1c6   :  { %v259_v13 = vpack.c.bf16 %v258_v12, %v257_v11  ;;  %561 = vmatpush.bf16.msra.mxu3 %v749_v2 }
 0x1c8   :  { %336 = vmatmul.bf16.vlgmr.msra.gmra.mxu1 %v259_v13 }
 0x1ca   :  { %562 = vmatpush.bf16.msra.mxu3 %v748_v4 }
 0x1ce   :  { %563 = vmatpush.bf16.msra.mxu3 %v747_v5 }
 0x245   :  { %v337_v15 = vpop.f32.mrf.mxu1 }
 0x246   :  { %v338_v16 = vadd.f32 %v766_v14, %v337_v15 }
 0x248   :  { %v342_v17 = vadd.f32 %v338_v16, %v156_v42 }
 0x24a   :  { %344 = vadd.xlane.f32.xlu2 %v342_v17 }
 0x24d   :  { %v339_v18 = vpop.f32.mrf.mxu1 }
 0x24e   :  { %v340_v19 = vadd.f32 %v766_v14, %v339_v18 }
 0x250   :  { %v343_v20 = vadd.f32 %v340_v19, %v157_v43 }
 0x252   :  { %346 = vadd.xlane.f32.xlu2 %v343_v20 }
 0x2bd   :  { %v345_v21 = vpop.xlane.xlu2 %344 }
 0x2be   :  { %v348_v22 = vmul.f32 0.03125, %v345_v21 }
 0x2c0   :  { %v350_v23 = vsub.f32 %v342_v17, %v348_v22 }
 0x2c2   :  { %v352_v24 = vsel %vm115_vm0, %v350_v23, 0.0 }
 0x2c3   :  { %v354_v25 = vmul.f32 %v352_v24, %v352_v24 }
 0x2c5   :  { %356 = vadd.xlane.f32.xlu0 %v354_v25  ;;  %v347_v26 = vpop.xlane.xlu2 %346 }
 0x2c6   :  { %v349_v27 = vmul.f32 0.03125, %v347_v26 }
 0x2c8   :  { %v351_v28 = vsub.f32 %v343_v20, %v349_v27 }
 0x2ca   :  { %v353_v29 = vsel %vm115_vm0, %v351_v28, 0.0 }
 0x2cb   :  { %v355_v30 = vmul.f32 %v353_v29, %v353_v29 }
 0x2cd   :  { %358 = vadd.xlane.f32.xlu1 %v355_v30  ;;  %v768_v30 = vld [vmem:[%s1064_s8] ss:$0 sm:$0xff] }
 0x338   :  { %v357_v39 = vpop.xlane.xlu0 %356 }
 0x339   :  { %v360_v3 = vmul.f32 0.03125, %v357_v39 }
 0x33b   :  { %v362_v40 = vadd.f32 1e-06, %v360_v3 }
 0x33d   :  { %777 = vrsqrt.f32 %v362_v40  ;;  %vm370_vm8 = vweird.f32 %v362_v40 }
 0x340   :  { %v359_v41 = vpop.xlane.xlu1 %358 }
 0x341   :  { %v361_v42 = vmul.f32 0.03125, %v359_v41 }
 0x343   :  { %v778_v43 = vpop.eup %777  ;;  %v363_v44 = vadd.f32 1e-06, %v361_v42 }
 0x344   :  { %v365_v45 = vmul.f32 %v778_v43, %v362_v40  ;;  %vm371_vm7 = vweird.f32 %v778_v43 }
 0x345   :  { %779 = vrsqrt.f32 %v363_v44  ;;  %vm372_vm10 = vmor %vm370_vm8, %vm371_vm7  ;;  %vm380_vm11 = vweird.f32 %v363_v44 }
 0x346   :  { %v366_v46 = vmul.f32 %v778_v43, %v365_v45 }
 0x348   :  { %v367_v47 = vmul.f32 0.5, %v366_v46 }
 0x34a   :  { %v368_v49 = vsub.f32 1.5, %v367_v47 }
 0x34b   :  { %v780_v48 = vpop.eup %779 }
 0x34c   :  { %v375_v50 = vmul.f32 %v780_v48, %v363_v44  ;;  %v369_v53 = vmul.f32 %v778_v43, %v368_v49  ;;  %vm381_vm9 = vweird.f32 %v780_v48 }
 0x34d   :  { %vm382_vm12 = vmor %vm380_vm11, %vm381_vm9 }
 0x34e   :  { %v376_v51 = vmul.f32 %v780_v48, %v375_v50  ;;  %v373_v55 = vsel %vm372_vm10, %v778_v43, %v369_v53 }
 0x34f   :  { %v384_v58 = vmul.f32 %v373_v55, %v352_v24 }
 0x350   :  { %v377_v52 = vmul.f32 0.5, %v376_v51 }
 0x352   :  { %v378_v54 = vsub.f32 1.5, %v377_v52 }
 0x354   :  { %v379_v56 = vmul.f32 %v780_v48, %v378_v54 }
 0x356   :  { %v383_v57 = vsel %vm382_vm12, %v780_v48, %v379_v56 }
 0x357   :  { %v385_v59 = vmul.f32 %v383_v57, %v353_v29 }
 0x359   :  { %v386_v60 = vpack.c.bf16 %v385_v59, %v384_v58 }
 0x35b   :  { %463 = vmatmul.bf16.vlgmr.msra.gmra.mxu2 %v386_v60 }
 0x3de   :  { %v464_v7 = vpop.f32.mrf.mxu2 }
 0x3df   :  { %v465_v8 = vadd.f32 %v767_v6, %v464_v7 }
 0x3e1   :  { %v471_v9 = vmul.f32 0.044715, %v465_v8  ;;  %v469_v24 = vmul.f32 0.5, %v465_v8 }
 0x3e3   :  { %v473_v10 = vmul.f32 %v471_v9, %v465_v8 }
 0x3e5   :  { %v475_v11 = vmul.f32 %v473_v10, %v465_v8 }
 0x3e6   :  { %v466_v12 = vpop.f32.mrf.mxu2 }
 0x3e7   :  { %v467_v13 = vadd.f32 %v767_v6, %v466_v12  ;;  %v477_v14 = vadd.f32 %v475_v11, %v465_v8 }
 0x3e9   :  { %v472_v15 = vmul.f32 0.044715, %v467_v13  ;;  %v479_v17 = vmul.f32 0.7978846, %v477_v14  ;;  %v470_v25 = vmul.f32 0.5, %v467_v13 }
 0x3eb   :  { %v474_v16 = vmul.f32 %v472_v15, %v467_v13  ;;  %781 = vtanh.f32 %v479_v17 }
 0x3ed   :  { %v476_v18 = vmul.f32 %v474_v16, %v467_v13 }
 0x3ef   :  { %v478_v19 = vadd.f32 %v476_v18, %v467_v13 }
 0x3f1   :  { %v480_v20 = vmul.f32 0.7978846, %v478_v19  ;;  %v782_v21 = vpop.eup %781 }
 0x3f2   :  { %v483_v22 = vadd.f32 1.0, %v782_v21 }
 0x3f3   :  { %783 = vtanh.f32 %v480_v20 }
 0x3f4   :  { %v485_v27 = vmul.f32 %v483_v22, %v469_v24 }
 0x3f9   :  { %v784_v23 = vpop.eup %783 }
 0x3fa   :  { %v484_v26 = vadd.f32 1.0, %v784_v23 }
 0x3fc   :  { %v486_v28 = vmul.f32 %v484_v26, %v470_v25 }
 0x3fe   :  { %v487_v29 = vpack.c.bf16 %v486_v28, %v485_v27 }
 0x400   :  { %564 = vmatmul.bf16.vlgmr.msra.gmra.mxu3 %v487_v29 }
 0x483   :  { %v565_v31 = vpop.f32.mrf.mxu3 }
 0x484   :  { %v566_v32 = vadd.f32 %v768_v30, %v565_v31 }
 0x486   :  { %v570_v33 = vadd.f32 %v566_v32, %v384_v58 }
 0x488   :  { %572 = vst [vmem:[#allocation11] sm:$0xff] %v570_v33 }
 0x48b   :  { %v567_v34 = vpop.f32.mrf.mxu3 }
 0x48c   :  { %v568_v35 = vadd.f32 %v768_v30, %v567_v34 }
 0x48e   :  { %v571_v36 = vadd.f32 %v568_v35, %v385_v59 }
 0x490   :  { %573 = vst [vmem:[#allocation11 + $0x8] sm:$0xff] %v571_v36 }
 0x491   :  { %586 = dma.vmem_to_hbm [thread:$0]  %s579_s18, 256, %s581_s21, [#allocation4], %s942_s27, %s942_s27, %s943_s28  }
 0x492   :  { %935 = dma.done.wait [#allocation4], 256  }
 0x493   :  { %936 = vsyncadd [#allocation4], 4294967040 }
 0x494   :  { %591 = vsyncpa [#allocation3], 1 }
 0x495   :  { %592 = vsyncpa [#allocation6], 1 }
 0x496   :  { %593 = vsyncpa [#allocation9], 1 }
 0x497   :  { %594 = vsyncpa [#allocation4], 1 }

</bundles_post_ra>
